<compile_context>
chip_gen: v6e
topology: v6e:2x2x1
jax: 0.10.0
libtpu: 0.0.40
codegen_flags: <defaults>
</compile_context>

<pallas_src>
import jax
import jax.numpy as jnp
from jax import lax
from jax.experimental import pallas as pl
from jax.experimental.pallas import tpu as pltpu

NUM_FEATURES = 2
LANE = 128                # one output row = 128 samples on the lane axis
MAX_BLOCK_ROWS = 2048     # 2048 rows -> 256K samples, ~3 MB HBM traffic/step
TARGET_GRID = 8           # keep >= ~8 grid steps (v7x megacore sharding)


def _linear_kernel(xi_ref, m_ref, b_ref, o_ref):
    # xi_ref: (rows, F*128) f32  -- native X layout, features interleaved on lanes
    # m_ref : (F*128, 128) f32   -- de-interleaving weight matrix (resident)
    # b_ref : (1,) f32 in SMEM   -- bias scalar
    # o_ref : (rows, 128) f32    -- one linear output per sample (lane-dense)
    acc = jnp.dot(xi_ref[...], m_ref[...],
                  preferred_element_type=jnp.float32,
                  precision=lax.Precision.HIGHEST)
    o_ref[...] = (acc + b_ref[0]).astype(o_ref.dtype)


def _round_up(v, m):
    return ((v + m - 1) // m) * m


def linear_reg_forward(x, weight, bias):
    """x: (B, F) f32, weight: (1, F) f32, bias: (1,) f32 -> (B, 1) f32."""
    B, F = x.shape
    R = pl.cdiv(B, LANE)          # number of 128-sample rows
    B_pad = R * LANE

    # Native layout: contiguous (free) reshape, no transpose.  Only a ragged
    # batch needs a small tail pad (single fused pass); never pad to tile size.
    x_in = x if B_pad == B else jnp.pad(x, ((0, B_pad - B), (0, 0)))
    xi = x_in.reshape(R, F * LANE)

    # De-interleaving weight matrix: M[F*i + f, i] = w[f]; y_row = xi_row @ M.
    w = weight.reshape(F).astype(jnp.float32)
    eye = jnp.eye(LANE, dtype=jnp.float32)
    m = (eye[:, None, :] * w[None, :, None]).reshape(F * LANE, LANE)

    b = bias.reshape(1).astype(jnp.float32)

    # Row-block: multiple of 8 sublanes, large enough to amortize the ~0.35us
    # per-step overhead, small enough to keep several grid steps + fit VMEM.
    if R <= 8:
        block_rows = R            # single full-extent block (tiny problem)
    else:
        block_rows = min(MAX_BLOCK_ROWS,
                         _round_up(pl.cdiv(R, TARGET_GRID), 8))
    grid = (pl.cdiv(R, block_rows),)   # ragged last block handled by masking

    yt = pl.pallas_call(
        _linear_kernel,
        out_shape=jax.ShapeDtypeStruct((R, LANE), x.dtype),
        grid=grid,
        in_specs=[
            pl.BlockSpec((block_rows, F * LANE), lambda i: (i, 0)),
            pl.BlockSpec((F * LANE, LANE), lambda i: (0, 0)),   # stays resident
            pl.BlockSpec(memory_space=pltpu.MemorySpace.SMEM),  # bias scalar
        ],
        out_specs=pl.BlockSpec((block_rows, LANE), lambda i: (i, 0)),
        compiler_params=pltpu.CompilerParams(
            dimension_semantics=("parallel",),
            vmem_limit_bytes=32 * 1024 * 1024,
        ),
    )(xi, m, b)

    y = yt.reshape(B_pad, 1)      # contiguous reshape: free
    if B_pad != B:
        y = y[:B]
    return y


if __name__ == "__main__":
    key = jax.random.PRNGKey(0)
    kx, kw, kb, kx2, kx3 = jax.random.split(key, 5)

    # Deterministic parameter init (mimicking nn.Linear's uniform init range).
    bound = 1.0 / (NUM_FEATURES ** 0.5)
    weight = jax.random.uniform(kw, (1, NUM_FEATURES), dtype=jnp.float32,
                                minval=-bound, maxval=bound)
    bias = jax.random.uniform(kb, (1,), dtype=jnp.float32,
                              minval=-bound, maxval=bound)

    def ref_forward(xv):
        # Exact f32 elementwise reference (independent of XLA matmul precision).
        return (xv * weight.reshape(1, NUM_FEATURES)).sum(
            axis=1, keepdims=True) + bias

    # Small shape matching the toy training harness (batch=8, F=2).
    x = jax.random.normal(kx, (8, NUM_FEATURES), dtype=jnp.float32)
    y = jax.block_until_ready(linear_reg_forward(x, weight, bias))
    assert y.shape == (8, 1)
    assert jnp.allclose(y, ref_forward(x), atol=1e-5, rtol=1e-5)

    # Large 128-divisible batch: multi-block pipelined fast path (no pad/copy).
    x2 = jax.random.normal(kx2, (128 * 4096, NUM_FEATURES), dtype=jnp.float32)
    y2 = jax.block_until_ready(linear_reg_forward(x2, weight, bias))
    assert y2.shape == (128 * 4096, 1)
    assert jnp.allclose(y2, ref_forward(x2), atol=1e-5, rtol=1e-5)

    # Ragged batch (not a multiple of 128): tail-pad path + ragged last block.
    x3 = jax.random.normal(kx3, (1000, NUM_FEATURES), dtype=jnp.float32)
    y3 = jax.block_until_ready(linear_reg_forward(x3, weight, bias))
    assert y3.shape == (1000, 1)
    assert jnp.allclose(y3, ref_forward(x3), atol=1e-5, rtol=1e-5)

    print("KERNEL_OK")
</pallas_src>

<mosaic_0001>
module attributes {stable_mosaic.version = 11 : i64} {
  func.func @_linear_kernel(%arg0: i32, %arg1: memref<1x256xf32, #tpu.memory_space<vmem>>, %arg2: memref<256x128xf32, #tpu.memory_space<vmem>>, %arg3: memref<1xf32, #tpu.memory_space<smem>>, %arg4: memref<1x128xf32, #tpu.memory_space<vmem>>) attributes {dimension_semantics = [#tpu.dimension_semantics<parallel>], iteration_bounds = array<i64: 1>, scalar_prefetch = 0 : i64, scratch_operands = 0 : i64, tpu.core_type = #tpu.core_type<tc>, window_params = [{transform_indices = @transform_0, window_bounds = array<i64: 1, 256>}, {pipeline_mode = #tpu.pipeline_mode<synchronous>, transform_indices = @transform_1, window_bounds = array<i64: 256, 128>}, {transform_indices = @transform_2, window_bounds = array<i64: 1>}, {transform_indices = @transform_3, window_bounds = array<i64: 1, 128>}]} {
    %c0 = arith.constant 0 : index
    %c0_0 = arith.constant 0 : index
    %0 = vector.load %arg1[%c0, %c0_0] : memref<1x256xf32, #tpu.memory_space<vmem>>, vector<1x256xf32>
    %c0_1 = arith.constant 0 : index
    %c0_2 = arith.constant 0 : index
    %1 = vector.load %arg2[%c0_1, %c0_2] : memref<256x128xf32, #tpu.memory_space<vmem>>, vector<256x128xf32>
    %cst = arith.constant dense<0.000000e+00> : vector<1x128xf32>
    %2 = tpu.matmul %0, %1, %cst {dimension_numbers = #tpu.dot_dimension_numbers<[1], [0], [0], [1], [0, 0, 1, 1], [], []>, precision = #tpu.contract_precision<fp32>} : vector<1x256xf32>, vector<256x128xf32>, vector<1x128xf32> -> vector<1x128xf32>
    %c0_3 = arith.constant 0 : index
    %3 = memref.load %arg3[%c0_3] : memref<1xf32, #tpu.memory_space<smem>>
    %4 = vector.broadcast %3 : f32 to vector<1x128xf32>
    %5 = arith.addf %2, %4 : vector<1x128xf32>
    %c0_4 = arith.constant 0 : index
    %c0_5 = arith.constant 0 : index
    %6 = vector.load %arg4[%c0_4, %c0_5] : memref<1x128xf32, #tpu.memory_space<vmem>>, vector<1x128xf32>
    tpu.vector_store %arg4[%c0_4, %c0_5], %5 {strides = array<i32>} : memref<1x128xf32, #tpu.memory_space<vmem>>, vector<1x128xf32>,
    return
  }
  func.func @transform_0(%arg0: i32) -> (i32, i32) {
    %c0_i32 = arith.constant 0 : i32
    %c0_i32_0 = arith.constant 0 : i32
    return %arg0, %c0_i32 : i32, i32
  }
  func.func @transform_1(%arg0: i32) -> (i32, i32) {
    %c0_i32 = arith.constant 0 : i32
    %c0_i32_0 = arith.constant 0 : i32
    %c0_i32_1 = arith.constant 0 : i32
    return %c0_i32, %c0_i32_0 : i32, i32
  }
  func.func @transform_2(%arg0: i32) -> i32 {
    %c0_i32 = arith.constant 0 : i32
    %c0_i32_0 = arith.constant 0 : i32
    return %c0_i32 : i32
  }
  func.func @transform_3(%arg0: i32) -> (i32, i32) {
    %c0_i32 = arith.constant 0 : i32
    %c0_i32_0 = arith.constant 0 : i32
    return %arg0, %c0_i32 : i32, i32
  }
}

</mosaic_0001>

<bundles_post_ra>
// kernel: tpu_custom_call.1
= control target key start
LH: loop header
LB: loop body
LE: loop exit
PB: predicated region body
PF: predicated region fallthrough
CT: control target
= control target key end

     0   :  { %9 = vsyncpa [#allocation4], 0  ;;  %s1858_s0 = inlined_call_operand.vmem [shape: f32[1,256], index: 0, kind: input, shape index: {}]   ;;  %s1859_s1 = inlined_call_operand.hbm [shape: f32[256,128], index: 1, kind: input, shape index: {}]   ;;  %s1860_s2 = inlined_call_operand.<no memory space> [shape: f32[1], index: 2, kind: input, shape index: {}]   ;;  %s1861_s3 = inlined_call_operand.hbm [shape: f32[1,128], index: 3, kind: output, shape index: {}]  }
   0x1   :  { %10 = vsyncpa [#allocation5], 0  ;;  %s1212_s12 = smov [#allocation3]  }
   0x2   :  { %s18_s13 = sshll.u32 %s1212_s12, 4  ;;  %s19_s13 = int_to_ptr.vmem [resolvable:$true] %s18_s13 }
   0x3   :  { %s1176_s14 = scalar_lea.vmem %s19_s13, 4096  ;;  %p1181_p1 = scmp.lt.s32.totalorder %s19_s13, %s19_s13 }
   0x4   :  { %p1177_p0 = scmp.ne.s32.totalorder %s19_s13, %s1176_s14  ;;  %p1182_p2 = scmp.lt.s32.totalorder %s1176_s14, %s1176_s14 }
   0x6   :  { %p1183_p3 = por %p1182_p2, %p1181_p1 }
   0x8   :  { %p1184_p4 = pnand %p1183_p3, %p1177_p0 }
   0xa   :  { %1187 = shalt.err (!%p1184_p4)
}
   0xb   :  { %s1213_s15 = smov 128   ;;  %s1214_s16 = smov 8  }
   0xc   :  { %24 = dma.hbm_to_vmem [thread:$0]  %s1859_s1, 4096, %s19_s13, [#allocation4], %s1213_s15, %s1213_s15, %s1214_s16  }
   0xd   :  { %1208 = dma.done.wait [#allocation4], 4096  }
   0xe   :  { %1209 = vsyncadd [#allocation4], 4294963200  ;;  %v66_v0 = vlaneseq  ;;  %v62_v2 = vld [vmem:[#allocation3 + $0xf8] sm:$0xff]  ;;  %v61_v4 = vld [vmem:[#allocation3 + $0xf0] sm:$0xff]  ;;  %s1215_s21 = smov [#allocation6]  }
   0xf   :  { %v46_v3 = vld [vmem:[#allocation3 + $0x78] sm:$0xff]  ;;  %v1243_v7 = vand.u32 4294901760, %v62_v2  ;;  %v1247_v9 = vand.u32 4294901760, %v61_v4  ;;  %v45_v10 = vld [vmem:[#allocation3 + $0x70] sm:$0xff]  ;;  %v60_v11 = vld [vmem:[#allocation3 + $0xe8] sm:$0xff]  ;;  %s945_s22 = sshll.u32 %s1215_s21, 4  ;;  %s946_s22 = int_to_ptr.vmem [resolvable:$true] %s945_s22 }
  0x10   :  { %v1239_v1 = vshrl.u32 %v66_v0, 7  ;;  %v1245_v8 = vand.u32 4294901760, %v46_v3  ;;  %v44_v12 = vld [vmem:[#allocation3 + $0x68] sm:$0xff]  ;;  %v1249_v13 = vand.u32 4294901760, %v45_v10  ;;  %v1251_v14 = vand.u32 4294901760, %v60_v11  ;;  %v59_v16 = vld [vmem:[#allocation3 + $0xe0] sm:$0xff]  ;;  %p1193_p6 = scmp.lt.s32.totalorder %s946_s22, %s946_s22 }
  0x11   :  { %v1253_v15 = vand.u32 4294901760, %v44_v12  ;;  %v43_v17 = vld [vmem:[#allocation3 + $0x60] sm:$0xff]  ;;  %v58_v18 = vld [vmem:[#allocation3 + $0xd8] sm:$0xff]  ;;  %954 = vmatprep.subr.mxu0 %v1243_v7  ;;  %v1256_v19 = vand.u32 4294901760, %v59_v16  ;;  %v1263_v22 = vsub.f32 %v62_v2, %v1243_v7  ;;  %v1267_v24 = vld [vmem:[#allocation3 + $0xd0] sm:$0xff]  ;;  %v1282_v29 = vsub.f32 %v61_v4, %v1247_v9  ;;  %s1192_s23 = scalar_lea.vmem %s946_s22, 32 }
  0x12   :  { %v1258_v20 = vand.u32 4294901760, %v43_v17  ;;  %v1260_v21 = vand.u32 4294901760, %v58_v18  ;;  %v1265_v23 = vld [vmem:[#allocation3 + $0x58] sm:$0xff]  ;;  %v1269_v25 = vld [vmem:[#allocation3 + $0x50] sm:$0xff]  ;;  %955 = vmatpush3.msra.mxu0 %v1245_v8  ;;  %v1276_v27 = vsub.f32 %v46_v3, %v1245_v8  ;;  %v1279_v28 = vand.u32 4294901760, %v1267_v24  ;;  %v1284_v30 = vld [vmem:[#allocation3 + $0xc8] sm:$0xff] }
  0x13   :  { %v1273_v26 = vand.u32 4294901760, %v1265_v23  ;;  %v1286_v31 = vld [vmem:[#allocation3 + $0x48] sm:$0xff]  ;;  %v1288_v32 = vld [vmem:[#allocation3 + $0xc0] sm:$0xff]  ;;  %956 = vmatprep.subr.mxu0 %v1247_v9  ;;  %v1873_v33 = vand.u32 4294901760, %v1263_v22  ;;  %v1293_v34 = vand.u32 4294901760, %v1269_v25  ;;  %v1296_v35 = vsub.f32 %v45_v10, %v1249_v13  ;;  %v1334_v50 = vld [vmem:[#allocation3 + $0xb8] sm:$0xff] }
  0x14   :  { %v1299_v36 = vand.u32 4294901760, %v1284_v30  ;;  %957 = vmatpush3.msra.mxu0 %v1249_v13  ;;  %v1871_v37 = vand.u32 4294901760, %v1276_v27  ;;  %v1870_v38 = vand.u32 4294901760, %v1282_v29  ;;  %v1305_v39 = vsub.f32 %v60_v11, %v1251_v14  ;;  %v1310_v41 = vld [vmem:[#allocation3 + $0x40] sm:$0xff]  ;;  %v1344_v55 = vld [vmem:[#allocation3 + $0x38] sm:$0xff]  ;;  %v1351_v60 = vld [vmem:[#allocation3 + $0xb0] sm:$0xff] }
  0x15   :  { %1929 = vst [vmem:[#allocation9_spill] sm:$0xff] %v1293_v34  ;;  %v1308_v40 = vand.u32 4294901760, %v1286_v31  ;;  %958 = vmatprep.subr.mxu0 %v1251_v14  ;;  %v304_v42 = vsub.f32 %v1263_v22, %v1873_v33  ;;  %v1868_v43 = vand.u32 4294901760, %v1296_v35  ;;  %v1318_v44 = vsub.f32 %v44_v12, %v1253_v15  ;;  %v1363_v2 = vld [vmem:[#allocation3 + $0x30] sm:$0xff]  ;;  %v1375_v12 = vld [vmem:[#allocation3 + $0xa8] sm:$0xff] }
  0x16   :  { %1930 = vst [vmem:[#allocation10_spill] sm:$0xff] %v1299_v36  ;;  %v1321_v45 = vand.u32 4294901760, %v1288_v32  ;;  %959 = vmatpush3.msra.mxu0 %v1253_v15  ;;  %v192_v46 = vsub.f32 %v1276_v27, %v1871_v37  ;;  %v311_v47 = vsub.f32 %v1282_v29, %v1870_v38  ;;  %v1866_v48 = vand.u32 4294901760, %v1305_v39  ;;  %v1453_v38 = vld [vmem:[#allocation3 + $0x18] sm:$0xff]  ;;  %v1466_v33 = vld [vmem:[#allocation3 + $0x90] sm:$0xff] }
  0x17   :  { %1931 = vst [vmem:[#allocation11_spill] sm:$0xff] %v1308_v40  ;;  %v1332_v49 = vsub.f32 %v59_v16, %v1256_v19  ;;  %960 = vmatprep.subr.mxu0 %v1256_v19  ;;  %v305_v51 = vand.u32 4294901760, %v304_v42  ;;  %v199_v52 = vsub.f32 %v1296_v35, %v1868_v43  ;;  %v1865_v53 = vand.u32 4294901760, %v1318_v44  ;;  %v1476_v6 = vld [vmem:[#allocation3 + $0x10] sm:$0xff] }
  0x18   :  { %1932 = vst [vmem:[#allocation12_spill] sm:$0xff] %v1321_v45  ;;  %v1342_v54 = vand.u32 4294901760, %v1310_v41  ;;  %961 = vmatpush3.msra.mxu0 %v1258_v20  ;;  %v193_v56 = vand.u32 4294901760, %v192_v46  ;;  %v312_v57 = vand.u32 4294901760, %v311_v47  ;;  %v318_v58 = vsub.f32 %v1305_v39, %v1866_v48 }
  0x19   :  { %v1863_v59 = vand.u32 4294901760, %v1332_v49  ;;  %962 = vmatprep.subr.mxu0 %v1260_v21  ;;  %989 = vmatprep.subr.mxu1 %v305_v51  ;;  %v200_v61 = vand.u32 4294901760, %v199_v52  ;;  %v206_v62 = vsub.f32 %v1318_v44, %v1865_v53  ;;  %v1358_v63 = vsub.f32 %v43_v17, %v1258_v20  ;;  %v1432_v53 = vld [vmem:[#allocation3 + $0x20] sm:$0xff] }
  0x1a   :  { %1933 = vst [vmem:[#allocation13_spill] sm:$0xff] %v1342_v54  ;;  %v1361_v0 = vand.u32 4294901760, %v1334_v50  ;;  %963 = vmatpush3.msra.mxu0 %v1273_v26  ;;  %990 = vmatpush3.msra.mxu1 %v193_v56  ;;  %v319_v3 = vand.u32 4294901760, %v318_v58  ;;  %v1370_v10 = vsub.f32 %v58_v18, %v1260_v21  ;;  %v1373_v11 = vand.u32 4294901760, %v1344_v55  ;;  %v1386_v18 = vld [vmem:[#allocation3 + $0x28] sm:$0xff] }
  0x1b   :  { %v325_v4 = vsub.f32 %v1332_v49, %v1863_v59  ;;  %964 = vmatprep.subr.mxu0 %v1279_v28  ;;  %991 = vmatprep.subr.mxu1 %v312_v57  ;;  %v207_v16 = vand.u32 4294901760, %v206_v62  ;;  %v1862_v17 = vand.u32 4294901760, %v1358_v63  ;;  %v1381_v42 = vsub.f32 %v1265_v23, %v1273_v26 }
  0x1c   :  { %1934 = vst [vmem:[#allocation14_spill] sm:$0xff] %v1361_v0  ;;  %1935 = vst [vmem:[#allocation15_spill] sm:$0xff] %v1373_v11  ;;  %v1384_v46 = vand.u32 4294901760, %v1351_v60  ;;  %965 = vmatpush3.msra.mxu0 %v1293_v34  ;;  %992 = vmatpush3.msra.mxu1 %v200_v61  ;;  %v1864_v51 = vand.u32 4294901760, %v1370_v10  ;;  %v1392_v52 = vsub.f32 %v1267_v24, %v1279_v28  ;;  %v1395_v56 = vand.u32 4294901760, %v1363_v2  ;;  %v1409_v24 = vld [vmem:[#allocation3 + $0xa0] sm:$0xff] }
  0x1d   :  { %v326_v47 = vand.u32 4294901760, %v325_v4  ;;  %966 = vmatprep.subr.mxu0 %v1299_v36  ;;  %993 = vmatprep.subr.mxu1 %v319_v3  ;;  %v213_v23 = vsub.f32 %v1358_v63, %v1862_v17  ;;  %v1867_v57 = vand.u32 4294901760, %v1381_v42  ;;  %v1404_v58 = vsub.f32 %v1269_v25, %v1293_v34 }
  0x1e   :  { %1936 = vst [vmem:[#allocation16_spill] sm:$0xff] %v1384_v46  ;;  %1937 = vst [vmem:[#allocation17_spill] sm:$0xff] %v1395_v56  ;;  %v1407_v61 = vand.u32 4294901760, %v1375_v12  ;;  %967 = vmatpush3.msra.mxu0 %v1308_v40  ;;  %994 = vmatpush3.msra.mxu1 %v207_v16  ;;  %v332_v62 = vsub.f32 %v1370_v10, %v1864_v51  ;;  %v1869_v3 = vand.u32 4294901760, %v1392_v52  ;;  %v1421_v25 = vand.u32 4294901760, %v1386_v18 }
  0x1f   :  { %v1418_v4 = vsub.f32 %v1284_v30, %v1299_v36  ;;  %968 = vmatprep.subr.mxu0 %v1321_v45  ;;  %995 = vmatprep.subr.mxu1 %v326_v47  ;;  %v214_v17 = vand.u32 4294901760, %v213_v23  ;;  %v220_v16 = vsub.f32 %v1381_v42, %v1867_v57  ;;  %v1872_v59 = vand.u32 4294901760, %v1404_v58  ;;  %v1442_v57 = vld [vmem:[#allocation3 + $0x98] sm:$0xff] }
  0x20   :  { %1938 = vst [vmem:[#allocation18_spill] sm:$0xff] %v1407_v61  ;;  %1939 = vst [vmem:[#allocation19_spill] sm:$0xff] %v1421_v25  ;;  %v1430_v51 = vsub.f32 %v1286_v31, %v1308_v40  ;;  %969 = vmatpush3.msra.mxu0 %v1342_v54  ;;  %v333_v30 = vand.u32 4294901760, %v332_v62  ;;  %v339_v47 = vsub.f32 %v1392_v52, %v1869_v3  ;;  %v1440_v48 = vand.u32 4294901760, %v1409_v24 }
  0x21   :  { %v1874_v23 = vand.u32 4294901760, %v1418_v4  ;;  %996 = vmatpush3.msra.mxu1 %v214_v17  ;;  %970 = vmatprep.subr.mxu0 %v1361_v0  ;;  %v221_v31 = vand.u32 4294901760, %v220_v16  ;;  %v227_v43 = vsub.f32 %v1404_v58, %v1872_v59  ;;  %v1451_v3 = vsub.f32 %v1288_v32, %v1321_v45 }
  0x22   :  { %1940 = vst [vmem:[#allocation20_spill] sm:$0xff] %v1440_v48  ;;  %v1875_v62 = vand.u32 4294901760, %v1430_v51  ;;  %997 = vmatprep.subr.mxu1 %v333_v30  ;;  %971 = vmatpush3.msra.mxu0 %v1373_v11  ;;  %v340_v37 = vand.u32 4294901760, %v339_v47  ;;  %v1460_v16 = vand.u32 4294901760, %v1432_v53  ;;  %v1464_v59 = vsub.f32 %v1310_v41, %v1342_v54 }
  0x23   :  { %v346_v17 = vsub.f32 %v1418_v4, %v1874_v23  ;;  %998 = vmatpush3.msra.mxu1 %v221_v31  ;;  %972 = vmatprep.subr.mxu0 %v1384_v46  ;;  %v228_v32 = vand.u32 4294901760, %v227_v43  ;;  %v1474_v23 = vand.u32 4294901760, %v1442_v57  ;;  %v1482_v43 = vsub.f32 %v1334_v50, %v1361_v0 }
  0x24   :  { %1941 = vst [vmem:[#allocation21_spill] sm:$0xff] %v1460_v16  ;;  %v234_v30 = vsub.f32 %v1430_v51, %v1875_v62  ;;  %999 = vmatprep.subr.mxu1 %v340_v37  ;;  %973 = vmatpush3.msra.mxu0 %v1395_v56  ;;  %v1882_v31 = vand.u32 4294901760, %v1464_v59  ;;  %v1485_v5 = vand.u32 4294901760, %v1453_v38  ;;  %v1487_v62 = vld [vmem:[#allocation3 + $0x88] sm:$0xff]  ;;  %v1944_v37 = vand.u32 4294901760, %v1451_v3 }
  0x25   :  { %1942 = vst [vmem:[#allocation22_spill] sm:$0xff] %v1474_v23  ;;  %v347_v41 = vand.u32 4294901760, %v346_v17  ;;  %1000 = vmatpush3.msra.mxu1 %v228_v32  ;;  %974 = vmatprep.subr.mxu0 %v1407_v61  ;;  %v1495_v17 = vsub.f32 %v1344_v55, %v1373_v11  ;;  %v1498_v50 = vand.u32 4294901760, %v1466_v33  ;;  %v1507_v0 = vsub.f32 %v1351_v60, %v1384_v46  ;;  %v1512_v55 = vld [vmem:[#allocation3 + $0x8] sm:$0xff]  ;;  %v1523_v60 = vld [vmem:[#allocation3 + $0x80] sm:$0xff] }
  0x26   :  { %1943 = vst [vmem:[#allocation23_spill] sm:$0xff] %v1485_v5  ;;  %v235_v47 = vand.u32 4294901760, %v234_v30  ;;  %v353_v54 = vsub.f32 %v1451_v3, %v1944_v37  ;;  %975 = vmatpush3.msra.mxu0 %v1421_v25  ;;  %v241_v32 = vsub.f32 %v1464_v59, %v1882_v31  ;;  %v1510_v37 = vand.u32 4294901760, %v1476_v6 }
  0x27   :  { %1001 = vmatprep.subr.mxu1 %v347_v41  ;;  %1945 = vst [vmem:[#allocation24_spill] sm:$0xff] %v1507_v0  ;;  %976 = vmatprep.subr.mxu0 %v1440_v48  ;;  %v1518_v31 = vsub.f32 %v1363_v2, %v1395_v56  ;;  %v1521_v30 = vand.u32 4294901760, %v1487_v62  ;;  %v1948_v45 = vand.u32 4294901760, %v1482_v43  ;;  %v1532_v11 = vsub.f32 %v1375_v12, %v1407_v61 }
  0x28   :  { %1946 = vst [vmem:[#allocation25_spill] sm:$0xff] %v1510_v37  ;;  %1002 = vmatpush3.msra.mxu1 %v235_v47  ;;  %v354_v41 = vand.u32 4294901760, %v353_v54  ;;  %977 = vmatpush3.msra.mxu0 %v1460_v16  ;;  %v242_v46 = vand.u32 4294901760, %v241_v32  ;;  %v1950_v2 = vand.u32 4294901760, %v1495_v17  ;;  %v1540_v32 = vand.u32 4294901760, %v1512_v55  ;;  %v1546_v54 = vld [vmem:[#allocation3] sm:$0xff] }
  0x29   :  { %1947 = vst [vmem:[#allocation26_spill] sm:$0xff] %v1521_v30  ;;  %v360_v47 = vsub.f32 %v1482_v43, %v1948_v45  ;;  %1949 = vst [vmem:[#allocation27_spill] sm:$0xff] %v1532_v11  ;;  %978 = vmatprep.subr.mxu0 %v1474_v23  ;;  %v1544_v45 = vsub.f32 %v1386_v18, %v1421_v25  ;;  %v1554_v40 = vand.u32 4294901760, %v1523_v60  ;;  %v30_v18 = vld [vmem:[%s1858_s0] sm:$0x3]  ;;  %v1573_v34 = vand.u32 4294901760, %v1546_v54 }
  0x2a   :  { %1003 = vmatprep.subr.mxu1 %v354_v41  ;;  %v248_v56 = vsub.f32 %v1495_v17, %v1950_v2  ;;  %1951 = vst [vmem:[#allocation28_spill] sm:$0xff] %v1540_v32  ;;  %979 = vmatpush3.msra.mxu0 %v1485_v5  ;;  %v1952_v41 = vand.u32 4294901760, %v1507_v0 }
  0x2b   :  { %1004 = vmatpush3.msra.mxu1 %v242_v46  ;;  %v361_v12 = vand.u32 4294901760, %v360_v47  ;;  %980 = vmatprep.subr.mxu0 %v1498_v50  ;;  %v1953_v46 = vand.u32 4294901760, %v1518_v31 }
  0x2c   :  { %v367_v61 = vsub.f32 %v1507_v0, %v1952_v41  ;;  %v249_v25 = vand.u32 4294901760, %v248_v56  ;;  %v1566_v41 = vsub.f32 %v1409_v24, %v1440_v48  ;;  %981 = vmatpush3.msra.mxu0 %v1510_v37  ;;  %v1954_v0 = vand.u32 4294901760, %v1532_v11 }
  0x2d   :  { %v255_v47 = vsub.f32 %v1518_v31, %v1953_v46  ;;  %1005 = vmatprep.subr.mxu1 %v361_v12  ;;  %v1577_v46 = vsub.f32 %v1432_v53, %v1460_v16  ;;  %982 = vmatprep.subr.mxu0 %v1521_v30  ;;  %v1955_v24 = vand.u32 4294901760, %v1544_v45  ;;  %v1956_v48 = vsub.s32 0, %v1239_v1 }
  0x2e   :  { %v368_v2 = vand.u32 4294901760, %v367_v61  ;;  %v374_v56 = vsub.f32 %v1532_v11, %v1954_v0  ;;  %1006 = vmatpush3.msra.mxu1 %v249_v25  ;;  %v1908_v12 = vand.u32 4294901760, %v1566_v41  ;;  %983 = vmatpush3.msra.mxu0 %v1540_v32  ;;  %v1957_v25 = vsub.s32 1, %v1239_v1 }
  0x2f   :  { %v256_v36 = vand.u32 4294901760, %v255_v47  ;;  %v262_v61 = vsub.f32 %v1544_v45, %v1955_v24  ;;  %v69_v0 = vrot.slane %v30_v18, %v1956_v48  ;;  %v1907_v53 = vand.u32 4294901760, %v1577_v46  ;;  %984 = vmatprep.subr.mxu0 %v1554_v40 }
  0x30   :  { %1007 = vmatprep.subr.mxu1 %v368_v2  ;;  %v375_v11 = vand.u32 4294901760, %v374_v56  ;;  %v73_v47 = vrot.slane %v30_v18, %v1957_v25  ;;  %v1592_v16 = vsub.f32 %v1442_v57, %v1474_v23  ;;  %v381_v48 = vsub.f32 %v1566_v41, %v1908_v12  ;;  %985 = vmatpush3.msra.mxu0 %v1573_v34 }
  0x31   :  { %1008 = vmatpush3.msra.mxu1 %v256_v36  ;;  %v263_v24 = vand.u32 4294901760, %v262_v61  ;;  %v1598_v2 = vand.u32 4294901760, %v69_v0  ;;  %v1602_v56 = vsub.f32 %v1453_v38, %v1485_v5  ;;  %v269_v1 = vsub.f32 %v1577_v46, %v1907_v53  ;;  %1024 = vmatprep.subr.mxu0 %v1263_v22 }
  0x32   :  { %1009 = vmatprep.subr.mxu1 %v375_v11  ;;  %v1608_v36 = vand.u32 4294901760, %v73_v47  ;;  %v1909_v57 = vand.u32 4294901760, %v1592_v16  ;;  %v1613_v18 = vsub.f32 %v1466_v33, %v1498_v50  ;;  %v382_v61 = vand.u32 4294901760, %v381_v48 }
  0x33   :  { %1958 = vst [vmem:[#allocation29_spill] sm:$0xff] %v1598_v2  ;;  %1010 = vmatpush3.msra.mxu1 %v263_v24  ;;  %v1617_v38 = vsub.f32 %v69_v0, %v1598_v2  ;;  %v1910_v11 = vand.u32 4294901760, %v1602_v56  ;;  %v1622_v25 = vsub.f32 %v1476_v6, %v1510_v37  ;;  %v270_v53 = vand.u32 4294901760, %v269_v1 }
  0x34   :  { %1959 = vst [vmem:[#allocation30_spill] sm:$0xff] %v1608_v36  ;;  %v1625_v12 = vsub.f32 %v73_v47, %v1608_v36  ;;  %v388_v33 = vsub.f32 %v1592_v16, %v1909_v57  ;;  %v1915_v24 = vand.u32 4294901760, %v1613_v18  ;;  %413 = vmatprep.mubr.f32.mxu1 %v1608_v36  ;;  %1011 = vmatprep.subr.mxu1 %v382_v61 }
  0x35   :  { %v276_v6 = vsub.f32 %v1602_v56, %v1910_v11  ;;  %v1639_v47 = vsub.f32 %v1487_v62, %v1521_v30  ;;  %1012 = vmatpush3.msra.mxu1 %v270_v53  ;;  %v1647_v0 = vsub.f32 %v1512_v55, %v1540_v32  ;;  %v1960_v11 = vand.u32 4294901760, %v1617_v38 }
  0x36   :  { %v389_v57 = vand.u32 4294901760, %v388_v33  ;;  %v395_v61 = vsub.f32 %v1613_v18, %v1915_v24  ;;  %v1961_v62 = vand.u32 4294901760, %v1622_v25  ;;  %v1962_v33 = vand.u32 4294901760, %v1625_v12 }
  0x37   :  { %v181_v48 = vsub.f32 %v1617_v38, %v1960_v11  ;;  %v277_v36 = vand.u32 4294901760, %v276_v6  ;;  %v1923_v1 = vand.u32 4294901760, %v1639_v47  ;;  %v1922_v55 = vand.u32 4294901760, %v1647_v0 }
  0x38   :  { %v283_v53 = vsub.f32 %v1622_v25, %v1961_v62  ;;  %v175_v30 = vsub.f32 %v1625_v12, %v1962_v33  ;;  %1013 = vmatprep.subr.mxu1 %v389_v57  ;;  %v396_v24 = vand.u32 4294901760, %v395_v61  ;;  %v1662_v32 = vsub.f32 %v1523_v60, %v1554_v40 }
  0x39   :  { %v182_v11 = vand.u32 4294901760, %v181_v48  ;;  %1014 = vmatpush3.msra.mxu1 %v277_v36  ;;  %v402_v62 = vsub.f32 %v1639_v47, %v1923_v1  ;;  %v1669_v37 = vsub.f32 %v1546_v54, %v1573_v34  ;;  %v290_v57 = vsub.f32 %v1647_v0, %v1922_v55  ;;  %v1977_v55 = vld [vmem:[#allocation20_spill] sm:$0xff]  ;;  %v1978_v1 = vld [vmem:[#allocation21_spill] sm:$0xff] }
  0x3a   :  { %v284_v6 = vand.u32 4294901760, %v283_v53  ;;  %v176_v33 = vand.u32 4294901760, %v175_v30  ;;  %1015 = vmatprep.subr.mxu1 %v396_v24  ;;  %v1921_v60 = vand.u32 4294901760, %v1662_v32 }
  0x3b   :  { %1963 = vst [vmem:[#allocation31_spill] sm:$0xff] %v1669_v37  ;;  %v403_v48 = vand.u32 4294901760, %v402_v62  ;;  %v1920_v36 = vand.u32 4294901760, %v1669_v37  ;;  %v291_v61 = vand.u32 4294901760, %v290_v57  ;;  %v1966_v62 = vld [vmem:[#allocation10_spill] sm:$0xff]  ;;  %v1968_v57 = vld [vmem:[#allocation27_spill] sm:$0xff] }
  0x3c   :  { %1016 = vmatpush3.msra.mxu1 %v284_v6  ;;  %177 = vmatprep.mubr.f32.mxu0 %v176_v33  ;;  %v409_v53 = vsub.f32 %v1662_v32, %v1921_v60  ;;  %v1965_v6 = vld [vmem:[#allocation24_spill] sm:$0xff]  ;;  %v1967_v33 = vld [vmem:[#allocation11_spill] sm:$0xff] }
  0x3d   :  { %183 = vmatmul.mubr.f32.vlgmr.msra.gmra.mxu0 %v182_v11  ;;  %1017 = vmatprep.subr.mxu1 %v403_v48  ;;  %v297_v30 = vsub.f32 %v1669_v37, %v1920_v36  ;;  %v1964_v11 = vld [vmem:[#allocation9_spill] sm:$0xff]  ;;  %v1969_v48 = vld [vmem:[#allocation12_spill] sm:$0xff]  ;;  %v1975_v36 = vld [vmem:[#allocation18_spill] sm:$0xff] }
  0x3e   :  { %1025 = vmatpush3.msra.mxu0 %v1276_v27  ;;  %1018 = vmatpush3.msra.mxu1 %v291_v61  ;;  %v410_v54 = vand.u32 4294901760, %v409_v53  ;;  %v1970_v61 = vld [vmem:[#allocation13_spill] sm:$0xff]  ;;  %v1971_v53 = vld [vmem:[#allocation14_spill] sm:$0xff]  ;;  %v1976_v60 = vld [vmem:[#allocation19_spill] sm:$0xff] }
  0x3f   :  { %1026 = vmatprep.subr.mxu0 %v1282_v29  ;;  %v298_v24 = vand.u32 4294901760, %v297_v30  ;;  %550 = vmatprep.mubr.f32.mxu0 %v1625_v12  ;;  %v1972_v30 = vld [vmem:[#allocation15_spill] sm:$0xff] }
  0x40   :  { %1027 = vmatpush3.msra.mxu0 %v1296_v35  ;;  %1019 = vmatprep.subr.mxu1 %v410_v54  ;;  %v1973_v54 = vld [vmem:[#allocation16_spill] sm:$0xff] }
  0x41   :  { %1028 = vmatprep.subr.mxu0 %v1305_v39  ;;  %1020 = vmatpush3.msra.mxu1 %v298_v24  ;;  %v1974_v24 = vld [vmem:[#allocation17_spill] sm:$0xff] }
  0x42   :  { %1029 = vmatpush3.msra.mxu0 %v1318_v44  ;;  %415 = vmatmul.mubr.f32.vlgmr.msra.gmra.mxu1 %v1598_v2  ;;  %v1979_v2 = vand.u32 4294901760, %v1263_v22  ;;  %v1986_v22 = vld [vmem:[#allocation28_spill] sm:$0xff] }
  0x43   :  { %1030 = vmatprep.subr.mxu0 %v1332_v49  ;;  %1059 = vmatprep.subr.mxu1 %v1243_v7 }
  0x44   :  { %1031 = vmatpush3.msra.mxu0 %v1358_v63  ;;  %1060 = vmatpush3.msra.mxu1 %v1245_v8 }
  0x45   :  { %1032 = vmatprep.subr.mxu0 %v1370_v10  ;;  %1061 = vmatprep.subr.mxu1 %v1247_v9 }
  0x46   :  { %1033 = vmatpush3.msra.mxu0 %v1381_v42  ;;  %1062 = vmatpush3.msra.mxu1 %v1249_v13 }
  0x47   :  { %1034 = vmatprep.subr.mxu0 %v1392_v52  ;;  %1063 = vmatprep.subr.mxu1 %v1251_v14 }
  0x48   :  { %1035 = vmatpush3.msra.mxu0 %v1404_v58  ;;  %1064 = vmatpush3.msra.mxu1 %v1253_v15 }
  0x49   :  { %1036 = vmatprep.subr.mxu0 %v1418_v4  ;;  %1065 = vmatprep.subr.mxu1 %v1256_v19 }
  0x4a   :  { %1037 = vmatpush3.msra.mxu0 %v1430_v51  ;;  %1066 = vmatpush3.msra.mxu1 %v1258_v20 }
  0x4b   :  { %1038 = vmatprep.subr.mxu0 %v1451_v3  ;;  %1067 = vmatprep.subr.mxu1 %v1260_v21 }
  0x4c   :  { %1039 = vmatpush3.msra.mxu0 %v1464_v59  ;;  %1068 = vmatpush3.msra.mxu1 %v1273_v26 }
  0x4d   :  { %1040 = vmatprep.subr.mxu0 %v1482_v43  ;;  %1069 = vmatprep.subr.mxu1 %v1279_v28 }
  0x4e   :  { %1041 = vmatpush3.msra.mxu0 %v1495_v17  ;;  %1070 = vmatpush3.msra.mxu1 %v1964_v11 }
  0x4f   :  { %1042 = vmatprep.subr.mxu0 %v1965_v6  ;;  %1071 = vmatprep.subr.mxu1 %v1966_v62 }
  0x50   :  { %1043 = vmatpush3.msra.mxu0 %v1518_v31  ;;  %1072 = vmatpush3.msra.mxu1 %v1967_v33 }
  0x51   :  { %1044 = vmatprep.subr.mxu0 %v1968_v57  ;;  %1073 = vmatprep.subr.mxu1 %v1969_v48 }
  0x52   :  { %1045 = vmatpush3.msra.mxu0 %v1544_v45  ;;  %1074 = vmatpush3.msra.mxu1 %v1970_v61 }
  0x53   :  { %1046 = vmatprep.subr.mxu0 %v1566_v41  ;;  %1075 = vmatprep.subr.mxu1 %v1971_v53 }
  0x54   :  { %1047 = vmatpush3.msra.mxu0 %v1577_v46  ;;  %1076 = vmatpush3.msra.mxu1 %v1972_v30 }
  0x55   :  { %1048 = vmatprep.subr.mxu0 %v1592_v16  ;;  %1077 = vmatprep.subr.mxu1 %v1973_v54 }
  0x56   :  { %1049 = vmatpush3.msra.mxu0 %v1602_v56  ;;  %1078 = vmatpush3.msra.mxu1 %v1974_v24 }
  0x57   :  { %1050 = vmatprep.subr.mxu0 %v1613_v18  ;;  %1079 = vmatprep.subr.mxu1 %v1975_v36 }
  0x58   :  { %1051 = vmatpush3.msra.mxu0 %v1622_v25  ;;  %1080 = vmatpush3.msra.mxu1 %v1976_v60  ;;  %v1980_v60 = vand.u32 4294901760, %v1276_v27  ;;  %v1987_v27 = vand.u32 4294901760, %v1318_v44  ;;  %v1993_v44 = vand.u32 4294901760, %v1381_v42  ;;  %v2009_v42 = vand.u32 4294901760, %v1602_v56 }
  0x59   :  { %1052 = vmatprep.subr.mxu0 %v1639_v47  ;;  %1081 = vmatprep.subr.mxu1 %v1977_v55  ;;  %v1982_v55 = vld [vmem:[#allocation25_spill] sm:$0xff] }
  0x5a   :  { %1053 = vmatpush3.msra.mxu0 %v1647_v0  ;;  %1082 = vmatpush3.msra.mxu1 %v1978_v1  ;;  %v1981_v1 = vand.u32 4294901760, %v1282_v29  ;;  %v1988_v29 = vand.u32 4294901760, %v1332_v49  ;;  %v1994_v49 = vand.u32 4294901760, %v1392_v52  ;;  %v2011_v52 = vand.u32 4294901760, %v1622_v25 }
  0x5b   :  { %1054 = vmatprep.subr.mxu0 %v1662_v32  ;;  %1083 = vmatprep.subr.mxu1 %v1474_v23  ;;  %v1983_v23 = vand.u32 4294901760, %v1296_v35  ;;  %v1989_v35 = vand.u32 4294901760, %v1625_v12  ;;  %v2022_v12 = vld [vmem:[#allocation22_spill] sm:$0xff] }
  0x5c   :  { %1055 = vmatpush3.msra.mxu0 %v1669_v37  ;;  %1084 = vmatpush3.msra.mxu1 %v1485_v5  ;;  %v1984_v37 = vld [vmem:[#allocation26_spill] sm:$0xff]  ;;  %v1985_v5 = vand.u32 4294901760, %v1305_v39  ;;  %v1992_v39 = vand.u32 4294901760, %v1370_v10  ;;  %v1996_v10 = vand.u32 4294901760, %v1418_v4  ;;  %v2014_v4 = vld [vmem:[#allocation19_spill] sm:$0xff] }
  0x5d   :  { %553 = vmatmul.mubr.f32.vlgmr.msra.gmra.mxu0 %v1617_v38  ;;  %1094 = vmatprep.subr.mxu0 %v1979_v2  ;;  %v2023_v2 = vld [vmem:[#allocation23_spill] sm:$0xff] }
  0x5e   :  { %1095 = vmatpush3.msra.mxu0 %v1980_v60  ;;  %1085 = vmatprep.subr.mxu1 %v1498_v50 }
  0x5f   :  { %1096 = vmatprep.subr.mxu0 %v1981_v1  ;;  %1086 = vmatpush3.msra.mxu1 %v1982_v55 }
  0x60   :  { %1097 = vmatpush3.msra.mxu0 %v1983_v23  ;;  %1087 = vmatprep.subr.mxu1 %v1984_v37  ;;  %v1990_v23 = vand.u32 4294901760, %v1358_v63  ;;  %v1995_v63 = vand.u32 4294901760, %v1404_v58  ;;  %v2012_v58 = vand.u32 4294901760, %v1639_v47 }
  0x61   :  { %1098 = vmatprep.subr.mxu0 %v1985_v5  ;;  %1088 = vmatpush3.msra.mxu1 %v1986_v22  ;;  %v1991_v5 = vand.u32 4294901760, %v1617_v38 }
  0x62   :  { %1099 = vmatpush3.msra.mxu0 %v1987_v27  ;;  %1089 = vmatprep.subr.mxu1 %v1554_v40 }
  0x63   :  { %1100 = vmatprep.subr.mxu0 %v1988_v29  ;;  %1090 = vmatpush3.msra.mxu1 %v1573_v34 }
  0x64   :  { %657 = vmatprep.mubr.f32.mxu1 %v1989_v35  ;;  %1101 = vmatpush3.msra.mxu0 %v1990_v23 }
  0x65   :  { %661 = vmatmul.mubr.f32.vlgmr.msra.gmra.mxu1 %v1991_v5  ;;  %1102 = vmatprep.subr.mxu0 %v1992_v39 }
  0x66   :  { %1129 = vmatprep.subr.mxu1 %v1243_v7  ;;  %1103 = vmatpush3.msra.mxu0 %v1993_v44  ;;  %v1997_v7 = vand.u32 4294901760, %v1430_v51  ;;  %v2010_v51 = vand.u32 4294901760, %v1613_v18 }
  0x67   :  { %1130 = vmatpush3.msra.mxu1 %v1245_v8  ;;  %1104 = vmatprep.subr.mxu0 %v1994_v49  ;;  %v1998_v8 = vand.u32 4294901760, %v1451_v3  ;;  %v2013_v3 = vand.u32 4294901760, %v1647_v0 }
  0x68   :  { %1131 = vmatprep.subr.mxu1 %v1247_v9  ;;  %1105 = vmatpush3.msra.mxu0 %v1995_v63  ;;  %v1999_v9 = vand.u32 4294901760, %v1464_v59  ;;  %v2008_v59 = vand.u32 4294901760, %v1592_v16  ;;  %v2015_v16 = vand.u32 4294901760, %v1662_v32 }
  0x69   :  { %1132 = vmatpush3.msra.mxu1 %v1249_v13  ;;  %1106 = vmatprep.subr.mxu0 %v1996_v10  ;;  %v2000_v13 = vand.u32 4294901760, %v1482_v43  ;;  %v2017_v43 = vld [vmem:[#allocation31_spill] sm:$0xff] }
  0x6a   :  { %1133 = vmatprep.subr.mxu1 %v1251_v14  ;;  %1107 = vmatpush3.msra.mxu0 %v1997_v7  ;;  %v2001_v14 = vand.u32 4294901760, %v1495_v17  ;;  %v2018_v17 = vand.u32 4294901760, %v2017_v43 }
  0x6b   :  { %1134 = vmatpush3.msra.mxu1 %v1253_v15  ;;  %1108 = vmatprep.subr.mxu0 %v1998_v8  ;;  %v2002_v15 = vand.u32 4294901760, %v1965_v6 }
  0x6c   :  { %1135 = vmatprep.subr.mxu1 %v1256_v19  ;;  %1109 = vmatpush3.msra.mxu0 %v1999_v9  ;;  %v2003_v19 = vand.u32 4294901760, %v1518_v31  ;;  %v2016_v31 = vld [vmem:[#allocation20_spill] sm:$0xff] }
  0x6d   :  { %1136 = vmatpush3.msra.mxu1 %v1258_v20  ;;  %1110 = vmatprep.subr.mxu0 %v2000_v13  ;;  %v2004_v20 = vand.u32 4294901760, %v1968_v57 }
  0x6e   :  { %1137 = vmatprep.subr.mxu1 %v1260_v21  ;;  %1111 = vmatpush3.msra.mxu0 %v2001_v14  ;;  %v2005_v21 = vand.u32 4294901760, %v1544_v45  ;;  %v2019_v45 = vld [vmem:[#allocation30_spill] sm:$0xff] }
  0x6f   :  { %1138 = vmatpush3.msra.mxu1 %v1273_v26  ;;  %1112 = vmatprep.subr.mxu0 %v2002_v15  ;;  %v2006_v26 = vand.u32 4294901760, %v1566_v41  ;;  %v2020_v41 = vld [vmem:[#allocation21_spill] sm:$0xff] }
  0x70   :  { %1139 = vmatprep.subr.mxu1 %v1279_v28  ;;  %1113 = vmatpush3.msra.mxu0 %v2003_v19  ;;  %v2007_v28 = vand.u32 4294901760, %v1577_v46  ;;  %v2021_v46 = vld [vmem:[#allocation29_spill] sm:$0xff] }
  0x71   :  { %1140 = vmatpush3.msra.mxu1 %v1964_v11  ;;  %1114 = vmatprep.subr.mxu0 %v2004_v20 }
  0x72   :  { %1141 = vmatprep.subr.mxu1 %v1966_v62  ;;  %1115 = vmatpush3.msra.mxu0 %v2005_v21 }
  0x73   :  { %1142 = vmatpush3.msra.mxu1 %v1967_v33  ;;  %1116 = vmatprep.subr.mxu0 %v2006_v26 }
  0x74   :  { %1143 = vmatprep.subr.mxu1 %v1969_v48  ;;  %1117 = vmatpush3.msra.mxu0 %v2007_v28 }
  0x75   :  { %1144 = vmatpush3.msra.mxu1 %v1970_v61  ;;  %1118 = vmatprep.subr.mxu0 %v2008_v59 }
  0x76   :  { %1145 = vmatprep.subr.mxu1 %v1971_v53  ;;  %1119 = vmatpush3.msra.mxu0 %v2009_v42 }
  0x77   :  { %1146 = vmatpush3.msra.mxu1 %v1972_v30  ;;  %1120 = vmatprep.subr.mxu0 %v2010_v51 }
  0x78   :  { %1147 = vmatprep.subr.mxu1 %v1973_v54  ;;  %1121 = vmatpush3.msra.mxu0 %v2011_v52 }
  0x79   :  { %1148 = vmatpush3.msra.mxu1 %v1974_v24  ;;  %1122 = vmatprep.subr.mxu0 %v2012_v58 }
  0x7a   :  { %1149 = vmatprep.subr.mxu1 %v1975_v36  ;;  %1123 = vmatpush3.msra.mxu0 %v2013_v3 }
  0x7b   :  { %1150 = vmatpush3.msra.mxu1 %v2014_v4  ;;  %1124 = vmatprep.subr.mxu0 %v2015_v16 }
  0x7c   :  { %1151 = vmatprep.subr.mxu1 %v2016_v31  ;;  %1125 = vmatpush3.msra.mxu0 %v2018_v17 }
  0x7d   :  { %827 = vmatprep.mubr.f32.mxu0 %v2019_v45  ;;  %1152 = vmatpush3.msra.mxu1 %v2020_v41 }
  0x7e   :  { %829 = vmatmul.mubr.f32.vlgmr.msra.gmra.mxu0 %v2021_v46  ;;  %1153 = vmatprep.subr.mxu1 %v2022_v12 }
  0x7f   :  { %1154 = vmatpush3.msra.mxu1 %v2023_v2  ;;  %931 = vmatprep.mubr.f32.mxu1 %v2019_v45 }
  0x80   :  { %1155 = vmatprep.subr.mxu1 %v1498_v50  ;;  %v64_v50 = vstv %s1860_s2  ;;  %s1188_s2 = scalar_lea.vmem %s946_s22, 16 }
  0x81   :  { %1156 = vmatpush3.msra.mxu1 %v1982_v55  ;;  %p1189_p5 = scmp.ne.s32.totalorder %s946_s22, %s1188_s2  ;;  %p1194_p7 = scmp.lt.s32.totalorder %s1192_s23, %s1188_s2 }
  0x82   :  { %1157 = vmatprep.subr.mxu1 %v1984_v37 }
  0x83   :  { %1158 = vmatpush3.msra.mxu1 %v1986_v22  ;;  %p1195_p8 = por %p1194_p7, %p1193_p6 }
  0x84   :  { %1159 = vmatprep.subr.mxu1 %v1554_v40 }
  0x85   :  { %1160 = vmatpush3.msra.mxu1 %v1573_v34  ;;  %p1196_p9 = pnand %p1195_p8, %p1189_p5 }
  0x86   :  { %933 = vmatmul.mubr.f32.vlgmr.msra.gmra.mxu1 %v2021_v46 }
  0xfd   :  { %v986_v32 = vpop.f32.mrf.mxu0 }
  0xff   :  { %v987_v56 = vpop.f32.mrf.mxu0 }
 0x100   :  { %v988_v0 = vadd.f32 %v987_v56, %v986_v32 }
 0x102   :  { %v1021_v18 = vpop.f32.mrf.mxu1  ;;  %v185_v55 = vadd.f32 %v988_v0, %v64_v50 }
 0x104   :  { %v1022_v25 = vpop.f32.mrf.mxu1 }
 0x105   :  { %v1023_v60 = vadd.f32 %v1022_v25, %v1021_v18 }
 0x107   :  { %v417_v11 = vadd.f32 %v1023_v60, %v185_v55 }
 0x11d   :  { %v1056_v38 = vpop.f32.mrf.mxu0 }
 0x11f   :  { %v1057_v47 = vpop.f32.mrf.mxu0 }
 0x120   :  { %v1058_v36 = vadd.f32 %v1057_v47, %v1056_v38 }
 0x122   :  { %v555_v62 = vadd.f32 %v1058_v36, %v417_v11 }
 0x125   :  { %v1091_v37 = vpop.f32.mrf.mxu1 }
 0x127   :  { %v1092_v40 = vpop.f32.mrf.mxu1 }
 0x128   :  { %v1093_v6 = vadd.f32 %v1092_v40, %v1091_v37 }
 0x12a   :  { %v663_v48 = vadd.f32 %v1093_v6, %v555_v62 }
 0x13e   :  { %v1126_v1 = vpop.f32.mrf.mxu0 }
 0x140   :  { %v1127_v34 = vpop.f32.mrf.mxu0 }
 0x141   :  { %v1128_v33 = vadd.f32 %v1127_v34, %v1126_v1 }
 0x143   :  { %v831_v53 = vadd.f32 %v1128_v33, %v663_v48 }
 0x146   :  { %v1161_v57 = vpop.f32.mrf.mxu1 }
 0x148   :  { %v1162_v61 = vpop.f32.mrf.mxu1 }
 0x149   :  { %v1163_v30 = vadd.f32 %v1162_v61, %v1161_v57 }
 0x14b   :  { %v935_v54 = vadd.f32 %v1163_v30, %v831_v53 }
 0x14d   :  { %938 = vst [vmem:[#allocation6] sm:$0x1] %v935_v54 }
 0x14e   :  { %1199 = shalt.err (!%p1196_p9)
}
 0x14f   :  { %948 = dma.vmem_to_hbm [thread:$0]  %s946_s22, 16, %s1861_s3, [#allocation5]  }
 0x150   :  { %1210 = dma.done.wait [#allocation5], 16  }
 0x151   :  { %1211 = vsyncadd [#allocation5], 4294967280 }
 0x152   :  { %952 = vsyncpa [#allocation4], 1 }
 0x153   :  { %953 = vsyncpa [#allocation5], 1 }

</bundles_post_ra>
